<compile_context>
chip_gen: v6e
topology: v6e:2x2x1
jax: 0.10.0
libtpu: 0.0.40
codegen_flags: <defaults>
</compile_context>

<pallas_src>
import functools

import jax
import jax.numpy as jnp
from jax.experimental import pallas as pl
from jax.experimental.pallas import tpu as pltpu

_LANE = 128      # lane granule (last dim)
_SUBLANE = 8     # sublane granule (second-to-last dim)


def _round_up(n, m):
    return ((n + m - 1) // m) * m


def measurer_kernel(x_ref, w1_ref, b1_ref, w2_ref, b2_ref, o_ref, *, out_dim):
    """One batch tile: softmax(relu(x @ W1 + b1) @ W2 + b2) over the last dim."""
    # Cast the x tile to the matmul dtype in VMEM (input stays f32 in HBM).
    x = x_ref[...].astype(w1_ref.dtype)

    # Layer 1: Linear (bf16 operands on the MXU, f32 accumulate) + bias + ReLU.
    h = jnp.dot(x, w1_ref[...], preferred_element_type=jnp.float32)
    h = jnp.maximum(h + b1_ref[...], 0.0)

    # Layer 2: Linear (bf16 operands, f32 accumulate) + bias.
    logits = jnp.dot(h.astype(w2_ref.dtype), w2_ref[...],
                     preferred_element_type=jnp.float32) + b2_ref[...]

    # Output columns were padded to a lane-dense multiple of 128; mask the
    # padded logits to a very negative value so they get zero probability.
    padded_out = logits.shape[-1]
    if padded_out != out_dim:
        col = jax.lax.broadcasted_iota(jnp.int32, logits.shape, 1)
        logits = jnp.where(col < out_dim, logits, jnp.float32(-1e30))

    # Numerically-stable softmax over the last dim (f32, matches F.softmax).
    m = jnp.max(logits, axis=-1, keepdims=True)
    e = jnp.exp(logits - m)
    denom = jnp.sum(e, axis=-1, keepdims=True)
    # Exact divide: rows sum to 1 to f32 precision (approx rcp was too coarse).
    o_ref[...] = (e / denom).astype(o_ref.dtype)


def prepare_measurer_params(w1, b1, w2, b2, *, matmul_dtype=jnp.bfloat16):
    """One-time weight prep, hoisted out of the hot forward path:
    cast matmul weights to bf16 and pad W2/b2 columns to a multiple of 128."""
    _, out_dim = w2.shape
    padded_out = _round_up(max(out_dim, _LANE), _LANE)
    b1 = jnp.asarray(b1).reshape(1, -1)
    b2 = jnp.asarray(b2).reshape(1, -1)
    if padded_out != out_dim:
        w2 = jnp.pad(w2, ((0, 0), (0, padded_out - out_dim)))
        b2 = jnp.pad(b2, ((0, 0), (0, padded_out - out_dim)))
    return dict(
        w1=jnp.asarray(w1).astype(matmul_dtype),
        b1=b1.astype(jnp.float32),
        w2=w2.astype(matmul_dtype),
        b2=b2.astype(jnp.float32),
        out_dim=int(out_dim),
    )


def measurer_forward(x, params, *, block_batch=1024, out_dtype=None):
    """softmax(relu(x @ w1 + b1) @ w2 + b2) with pre-prepared params."""
    batch, in_dim = x.shape
    w1, b1, w2, b2 = params["w1"], params["b1"], params["w2"], params["b2"]
    out_dim = params["out_dim"]
    hidden_dim, padded_out = w2.shape
    out_dtype = x.dtype if out_dtype is None else out_dtype

    # --- Batch tiling: tb multiple of 8; no wrapper-side batch padding. -----
    tb = min(block_batch, _round_up(batch, _SUBLANE))
    tb = _round_up(tb, _SUBLANE)
    if batch >= 2 * _SUBLANE:
        # >= 2 grid steps so the "parallel" axis can shard both v7x TensorCores.
        tb = min(tb, _round_up(pl.cdiv(batch, 2), _SUBLANE))
    grid = (pl.cdiv(batch, tb),)

    # --- VMEM budget derived from actual sizes (safe on v7x's 64 MiB). ------
    out_itemsize = jnp.dtype(out_dtype).itemsize
    tile_bytes = (tb * in_dim * x.dtype.itemsize
                  + tb * padded_out * out_itemsize)
    weight_bytes = (w1.size * w1.dtype.itemsize + w2.size * w2.dtype.itemsize
                    + b1.size * b1.dtype.itemsize + b2.size * b2.dtype.itemsize)
    vmem_needed = 2 * tile_bytes + 2 * weight_bytes      # double-buffered
    vmem_limit = int(min(max(vmem_needed + (4 << 20), 16 << 20), 56 << 20))

    flops = 2 * batch * (in_dim * hidden_dim + hidden_dim * padded_out)
    bytes_accessed = (x.size * x.dtype.itemsize
                      + weight_bytes
                      + batch * padded_out * out_itemsize)
    cost = pl.CostEstimate(
        flops=int(flops),
        transcendentals=int(batch * padded_out),          # exp
        bytes_accessed=int(bytes_accessed),
    )

    kernel = functools.partial(measurer_kernel, out_dim=out_dim)

    out_padded = pl.pallas_call(
        kernel,
        out_shape=jax.ShapeDtypeStruct((batch, padded_out), out_dtype),
        grid_spec=pltpu.PrefetchScalarGridSpec(
            num_scalar_prefetch=0,
            grid=grid,
            in_specs=[
                pl.BlockSpec((tb, in_dim), lambda i: (i, 0)),              # x tile
                pl.BlockSpec((in_dim, hidden_dim), lambda i: (0, 0)),      # W1 (resident)
                pl.BlockSpec((1, hidden_dim), lambda i: (0, 0)),           # b1 (resident)
                pl.BlockSpec((hidden_dim, padded_out), lambda i: (0, 0)),  # W2 (resident)
                pl.BlockSpec((1, padded_out), lambda i: (0, 0)),           # b2 (resident)
            ],
            out_specs=pl.BlockSpec((tb, padded_out), lambda i: (i, 0)),
        ),
        compiler_params=pltpu.CompilerParams(
            dimension_semantics=("parallel",),   # megacore-shard the batch axis
            vmem_limit_bytes=vmem_limit,
        ),
        cost_estimate=cost,
    )(x, w1, b1, w2, b2)

    # Padded columns hold exact zeros; slice the real columns back out.
    # TODO(synk): return the padded slab / fuse the slice into the consumer
    #             when the caller can accept it (removes one output read pass).
    if padded_out != out_dim:
        return out_padded[:, :out_dim]
    return out_padded


def init_params(key, in_dim, hidden_dim, out_dim):
    """Deterministic synthetic init (PyTorch-Linear-like uniform bounds)."""
    k1, k2, k3, k4 = jax.random.split(key, 4)
    bound1 = 1.0 / (in_dim ** 0.5)
    bound2 = 1.0 / (hidden_dim ** 0.5)
    w1 = jax.random.uniform(k1, (in_dim, hidden_dim), jnp.float32, -bound1, bound1)
    b1 = jax.random.uniform(k2, (1, hidden_dim), jnp.float32, -bound1, bound1)
    w2 = jax.random.uniform(k3, (hidden_dim, out_dim), jnp.float32, -bound2, bound2)
    b2 = jax.random.uniform(k4, (1, out_dim), jnp.float32, -bound2, bound2)
    return w1, b1, w2, b2


if __name__ == "__main__":
    # Small demo shapes; batch=20 with block_batch=8 exercises the batch grid
    # (3 steps, ragged last block) plus output-column lane padding + slicing.
    batch, in_dim, hidden_dim, out_dim = 20, 32, 64, 16

    key = jax.random.PRNGKey(0)
    kx, kp = jax.random.split(key)
    x = jax.random.normal(kx, (batch, in_dim), jnp.float32)
    w1, b1, w2, b2 = init_params(kp, in_dim, hidden_dim, out_dim)

    params = prepare_measurer_params(w1, b1, w2, b2)       # one-time weight prep
    out = measurer_forward(x, params, block_batch=8)
    jax.block_until_ready(out)
    assert out.shape == (batch, out_dim)

    # Reference matching the kernel's bf16-matmul / f32-accumulate precision.
    xm = x.astype(jnp.bfloat16)
    w1m = w1.astype(jnp.bfloat16)
    w2m = w2.astype(jnp.bfloat16)
    h_ref = jnp.maximum(
        jnp.dot(xm, w1m, preferred_element_type=jnp.float32) + b1, 0.0)
    logits_ref = jnp.dot(h_ref.astype(jnp.bfloat16), w2m,
                         preferred_element_type=jnp.float32) + b2
    ref = jax.nn.softmax(logits_ref, axis=-1)
    assert jnp.allclose(out, ref, atol=2e-3), "mismatch vs bf16-matched reference"

    # Row sums == 1 to f32 precision (exact divide in the kernel).
    assert jnp.allclose(jnp.sum(out, axis=-1), 1.0, atol=1e-5)

    # Loose sanity cross-check against the full-f32 PyTorch-semantics forward
    # (documents the bf16-matmul precision trade-off).
    ref_f32 = jax.nn.softmax(jnp.maximum(x @ w1 + b1, 0.0) @ w2 + b2, axis=-1)
    assert jnp.allclose(out, ref_f32, atol=1e-1), "structural mismatch vs f32 reference"

    print("KERNEL_OK")
</pallas_src>

<mosaic_0001>
module attributes {stable_mosaic.version = 11 : i64} {
  func.func @measurer_kernel(%arg0: i32, %arg1: memref<8x32xf32, #tpu.memory_space<vmem>>, %arg2: memref<32x64xbf16, #tpu.memory_space<vmem>>, %arg3: memref<1x64xf32, #tpu.memory_space<vmem>>, %arg4: memref<64x128xbf16, #tpu.memory_space<vmem>>, %arg5: memref<1x128xf32, #tpu.memory_space<vmem>>, %arg6: memref<8x128xf32, #tpu.memory_space<vmem>>) attributes {dimension_semantics = [#tpu.dimension_semantics<parallel>], iteration_bounds = array<i64: 3>, scalar_prefetch = 0 : i64, scratch_operands = 0 : i64, tpu.core_type = #tpu.core_type<tc>, window_params = [{transform_indices = @transform_0, window_bounds = array<i64: 8, 32>}, {pipeline_mode = #tpu.pipeline_mode<synchronous>, transform_indices = @transform_1, window_bounds = array<i64: 32, 64>}, {pipeline_mode = #tpu.pipeline_mode<synchronous>, transform_indices = @transform_2, window_bounds = array<i64: 1, 64>}, {pipeline_mode = #tpu.pipeline_mode<synchronous>, transform_indices = @transform_3, window_bounds = array<i64: 64, 128>}, {pipeline_mode = #tpu.pipeline_mode<synchronous>, transform_indices = @transform_4, window_bounds = array<i64: 1, 128>}, {transform_indices = @transform_5, window_bounds = array<i64: 8, 128>}]} {
    %c0 = arith.constant 0 : index
    %c0_0 = arith.constant 0 : index
    %0 = vector.load %arg1[%c0, %c0_0] : memref<8x32xf32, #tpu.memory_space<vmem>>, vector<8x32xf32>
    %1 = arith.truncf %0 : vector<8x32xf32> to vector<8x32xbf16>
    %c0_1 = arith.constant 0 : index
    %c0_2 = arith.constant 0 : index
    %2 = vector.load %arg2[%c0_1, %c0_2] : memref<32x64xbf16, #tpu.memory_space<vmem>>, vector<32x64xbf16>
    %cst = arith.constant dense<0.000000e+00> : vector<8x64xf32>
    %3 = tpu.matmul %1, %2, %cst {dimension_numbers = #tpu.dot_dimension_numbers<[1], [0], [0], [1], [0, 0, 1, 1], [], []>} : vector<8x32xbf16>, vector<32x64xbf16>, vector<8x64xf32> -> vector<8x64xf32>
    %c0_3 = arith.constant 0 : index
    %c0_4 = arith.constant 0 : index
    %4 = vector.load %arg3[%c0_3, %c0_4] : memref<1x64xf32, #tpu.memory_space<vmem>>, vector<1x64xf32>
    %5 = vector.broadcast %4 : vector<1x64xf32> to vector<8x64xf32>
    %6 = arith.addf %3, %5 : vector<8x64xf32>
    %cst_5 = arith.constant 0.000000e+00 : f32
    %7 = vector.broadcast %cst_5 : f32 to vector<8x64xf32>
    %8 = arith.maximumf %6, %7 : vector<8x64xf32>
    %9 = arith.truncf %8 : vector<8x64xf32> to vector<8x64xbf16>
    %c0_6 = arith.constant 0 : index
    %c0_7 = arith.constant 0 : index
    %10 = vector.load %arg4[%c0_6, %c0_7] : memref<64x128xbf16, #tpu.memory_space<vmem>>, vector<64x128xbf16>
    %cst_8 = arith.constant dense<0.000000e+00> : vector<8x128xf32>
    %11 = tpu.matmul %9, %10, %cst_8 {dimension_numbers = #tpu.dot_dimension_numbers<[1], [0], [0], [1], [0, 0, 1, 1], [], []>} : vector<8x64xbf16>, vector<64x128xbf16>, vector<8x128xf32> -> vector<8x128xf32>
    %c0_9 = arith.constant 0 : index
    %c0_10 = arith.constant 0 : index
    %12 = vector.load %arg5[%c0_9, %c0_10] : memref<1x128xf32, #tpu.memory_space<vmem>>, vector<1x128xf32>
    %13 = vector.broadcast %12 : vector<1x128xf32> to vector<8x128xf32>
    %14 = arith.addf %11, %13 : vector<8x128xf32>
    %15 = tpu.iota {dimensions = array<i32: 1>} : vector<8x128xi32>
    %c16_i32 = arith.constant 16 : i32
    %16 = vector.broadcast %c16_i32 : i32 to vector<8x128xi32>
    %17 = arith.cmpi slt, %15, %16 : vector<8x128xi32>
    %cst_11 = arith.constant -1.000000e+30 : f32
    %18 = vector.broadcast %cst_11 : f32 to vector<8x128xf32>
    %19 = arith.select %17, %14, %18 : vector<8x128xi1>, vector<8x128xf32>
    %cst_12 = arith.constant dense<0xFF800000> : vector<8xf32>
    %20 = vector.multi_reduction <maximumf>, %19, %cst_12 [1] : vector<8x128xf32> to vector<8xf32>
    %21 = vector.shape_cast %20 : vector<8xf32> to vector<8x1xf32>
    %22 = vector.broadcast %21 : vector<8x1xf32> to vector<8x128xf32>
    %23 = arith.subf %19, %22 : vector<8x128xf32>
    %24 = math.exp %23 : vector<8x128xf32>
    %cst_13 = arith.constant dense<0.000000e+00> : vector<8xf32>
    %25 = vector.multi_reduction <add>, %24, %cst_13 [1] : vector<8x128xf32> to vector<8xf32>
    %26 = vector.shape_cast %25 : vector<8xf32> to vector<8x1xf32>
    %27 = vector.broadcast %26 : vector<8x1xf32> to vector<8x128xf32>
    %28 = arith.divf %24, %27 : vector<8x128xf32>
    %c0_14 = arith.constant 0 : index
    %c0_15 = arith.constant 0 : index
    %29 = vector.load %arg6[%c0_14, %c0_15] : memref<8x128xf32, #tpu.memory_space<vmem>>, vector<8x128xf32>
    tpu.vector_store %arg6[%c0_14, %c0_15], %28 {strides = array<i32>} : memref<8x128xf32, #tpu.memory_space<vmem>>, vector<8x128xf32>,
    return
  }
  func.func @transform_0(%arg0: i32) -> (i32, i32) {
    %c0_i32 = arith.constant 0 : i32
    %c0_i32_0 = arith.constant 0 : i32
    return %arg0, %c0_i32 : i32, i32
  }
  func.func @transform_1(%arg0: i32) -> (i32, i32) {
    %c0_i32 = arith.constant 0 : i32
    %c0_i32_0 = arith.constant 0 : i32
    %c0_i32_1 = arith.constant 0 : i32
    return %c0_i32, %c0_i32_0 : i32, i32
  }
  func.func @transform_2(%arg0: i32) -> (i32, i32) {
    %c0_i32 = arith.constant 0 : i32
    %c0_i32_0 = arith.constant 0 : i32
    %c0_i32_1 = arith.constant 0 : i32
    return %c0_i32, %c0_i32_0 : i32, i32
  }
  func.func @transform_3(%arg0: i32) -> (i32, i32) {
    %c0_i32 = arith.constant 0 : i32
    %c0_i32_0 = arith.constant 0 : i32
    %c0_i32_1 = arith.constant 0 : i32
    return %c0_i32, %c0_i32_0 : i32, i32
  }
  func.func @transform_4(%arg0: i32) -> (i32, i32) {
    %c0_i32 = arith.constant 0 : i32
    %c0_i32_0 = arith.constant 0 : i32
    %c0_i32_1 = arith.constant 0 : i32
    return %c0_i32, %c0_i32_0 : i32, i32
  }
  func.func @transform_5(%arg0: i32) -> (i32, i32) {
    %c0_i32 = arith.constant 0 : i32
    %c0_i32_0 = arith.constant 0 : i32
    return %arg0, %c0_i32 : i32, i32
  }
}

</mosaic_0001>

<bundles_post_ra>
// kernel: tpu_custom_call.1
= control target key start
LH: loop header
LB: loop body
LE: loop exit
PB: predicated region body
PF: predicated region fallthrough
CT: control target
= control target key end

     0   :  { %10 = vsyncpa [#allocation3], 0  ;;  %s1037_s0 = inlined_call_operand.hbm [shape: f32[20,32], index: 0, kind: input, shape index: {}]   ;;  %s1038_s1 = inlined_call_operand.hbm [shape: bf16[32,64], index: 1, kind: input, shape index: {}]   ;;  %s1039_s2 = inlined_call_operand.vmem [shape: f32[1,64], index: 2, kind: input, shape index: {}]   ;;  %s1040_s3 = inlined_call_operand.hbm [shape: bf16[64,128], index: 3, kind: input, shape index: {}]   ;;  %s1041_s4 = inlined_call_operand.vmem [shape: f32[1,128], index: 4, kind: input, shape index: {}]   ;;  %s1042_s5 = inlined_call_operand.hbm [shape: f32[20,128], index: 5, kind: output, shape index: {}]  }
   0x1   :  { %12 = vsyncpa [#allocation3 + $0x1], 0 }
   0x2   :  { %13 = vsyncpa [#allocation6], 0 }
   0x3   :  { %14 = vsyncpa [#allocation4], 0 }
   0x4   :  { %16 = vsyncpa [#allocation4 + $0x1], 0  ;;  %s864_s18 = smov 0   ;;  %s866_s19 = smov 0  }
   0x5   :  { %s868_s20 = smov 0   ;;  %s870_s21 = smov 0  }
   0x6 LB: > { %s885_s22 = sadd.s32 4294967295, %s824_s21   ;;  %s541_s23 = sadd.s32 4294967294, %s824_s21   ;;  %s824_s21 = sphi %s870_s21, %s1063_s21   ;;  %s820_s20 = sphi %s868_s20, %s1062_s20   ;;  %s816_s19 = sphi %s866_s19, %s1061_s19   ;;  %s812_s18 = sphi %s864_s18, %s1060_s18  }
   0x7   : > { %p42_p0 = scmp.ne.s32.totalorder %s816_s19, %s812_s18  ;;  %p1043_p1 = scmp.eq.s32.totalorder %s885_s22, 0 }
   0x8   : > { %p156_p3 = scmp.eq.s32.totalorder %s541_s23, 2  ;;  %p542_p5 = scmp.ge.s32.totalorder %s824_s21, 1 }
   0x9   : > { %p894_p4 = por %p1043_p1, %p42_p0  ;;  %p163_p7 = scmp.lt.s32.totalorder %s824_s21, 4 }
   0xa   : > { %p899_p6 = por %p156_p3, %p42_p0  ;;  %s826_s27 = smov [#allocation5]  }
   0xb   : > { %s1047_s24 = scalar_select %p894_p4, 1, 0 }
   0xc   : > { %s1048_s25 = scalar_select %p899_p6, 1, 0 }
   0xd   : > { %p904_p8 = pnand %p542_p5, %p163_p7  ;;  %s175_s28 = sshll.u32 %s826_s27, 4  ;;  %s176_s28 = int_to_ptr.vmem [resolvable:$true] %s175_s28 }
   0xe   : > { %s827_s30 = smov [#allocation7]   ;;  %s687_s7 = scalar_lea.vmem %s176_s28, 256 }
   0xf   : > { %s1049_s26 = scalar_select %p904_p8, 1, 0 }
  0x10   : > { %p607_p9 = pneg %p904_p8  ;;  %s191_s6 = sshll.u32 %s827_s30, 4  ;;  %s192_s6 = int_to_ptr.vmem [resolvable:$true] %s191_s6 }
  0x11   : > { %p688_p12 = scmp.ne.s32.totalorder %s176_s28, %s687_s7  ;;  %p695_p3 = scmp.lt.s32.totalorder %s176_s28, %s176_s28 }
  0x12   : > { %p912_p10 = pnand %p607_p9, %p1043_p1  ;;  %p696_p5 = scmp.lt.s32.totalorder %s687_s7, %s687_s7 }
  0x14   : > { %p678_p11 = pneg %p912_p10  ;;  %p697_p7 = por %p696_p5, %p695_p3 }
  0x16   : > { %p690_p13 = pnand %p688_p12, %p678_p11 }
  0x18   : > { %p691_p0 = pneg %p690_p13 }
  0x1a   : > { %p698_p9 = pnand %p697_p7, %p691_p0 }
  0x1c   : > { %701 = shalt.err (!%p698_p9)
}
  0x1d   : > { %s828_s8 = smov 64   ;;  %s829_s9 = smov 4  }
  0x1e   : > { %610 = dma.hbm_to_vmem [thread:$0]  (!%p912_p10), %s1038_s1, 256, %s176_s28, [#allocation6], %s828_s8, %s828_s8, %s829_s9  }
  0x1f   : > { %s713_s12 = scalar_lea.vmem %s192_s6, 512  ;;  %p721_p2 = scmp.lt.s32.totalorder %s192_s6, %s192_s6 }
  0x20   : > { %p714_p1 = scmp.ne.s32.totalorder %s192_s6, %s713_s12  ;;  %p722_p6 = scmp.lt.s32.totalorder %s713_s12, %s713_s12 }
  0x22   : > { %p716_p12 = pnand %p714_p1, %p678_p11  ;;  %p723_p3 = por %p722_p6, %p721_p2 }
  0x24   : > { %p717_p13 = pneg %p716_p12 }
  0x26   : > { %p724_p0 = pnand %p723_p3, %p717_p13 }
  0x28   : > { %727 = shalt.err (!%p724_p0)
}
  0x29   : > { %613 = dma.hbm_to_vmem [thread:$0]  (!%p912_p10), %s1040_s3, 512, %s192_s6, [#allocation6], %s828_s8, %s828_s8, %s829_s9  }
  0x2a   : > { %s935_s15 = sadd.s32 1, %s824_s21   ;;  %s29_s16 = sadd.s32 1, %s820_s20 }
  0x2b   : > { %s26_s17 = ssub.s32 %s824_s21, %s935_s15  ;;  %p36_p1 = scmp.ne.s32.totalorder %s820_s20, %s816_s19 }
  0x2c   : > { %p27_p2 = scmp.eq.s32.totalorder %s26_s17, 0  ;;  %p37_p6 = scmp.eq.s32.totalorder %s824_s21, 0 }
  0x2d   : > { %p1051_p11 = scmp.eq.s32.totalorder %s885_s22, 2  ;;  %p624_p7 = scmp.lt.s32.totalorder %s824_s21, 3 }
  0x2e   : > { %s951_s27 = scalar_select %p27_p2, %s820_s20, %s29_s16  }
  0x2f   : > { %p945_p5 = por %p1051_p11, %p36_p1  ;;  %p38_p9 = por %p37_p6, %p36_p1 }
  0x30   : > { %s208_s28 = sand.u32 1, %s820_s20   ;;  %s547_s30 = sshll.u32 %s824_s21, 7 }
  0x31   : > { %s1052_s23 = scalar_select %p945_p5, 1, 0 }
  0x32   : > { %s546_s29 = sshll.u32 %s208_s28, 3  ;;  %s958_s8 = scalar_lea.hbm %s1037_s0, %s547_s30 }
  0x33   : > { %s212_s9 = scalar_lea.vmem [#allocation2], %s546_s29  ;;  %p960_p10 = pnand %p624_p7, %p38_p9 }
  0x34   : > { %s219_s10 = sshll.u32 %s212_s9, 4  ;;  %s209_s12 = scalar_lea.sflag [#allocation3], %s208_s28  ;;  %s220_s10 = int_to_ptr.vmem [resolvable:$true] %s219_s10 }
  0x35   : > { %s728_s13 = scalar_lea.hbm %s958_s8, 128  ;;  %p730_p13 = pneg %p960_p10 }
  0x36   : > { %p729_p12 = scmp.ne.s32.totalorder %s958_s8, %s728_s13  ;;  %s733_s17 = scalar_lea.hbm %s1037_s0, 384 }
  0x37   : > { %p734_p1 = scmp.lt.s32.totalorder %s958_s8, %s1037_s0  ;;  %p735_p2 = scmp.lt.s32.totalorder %s733_s17, %s728_s13 }
  0x38   : > { %p731_p3 = pnand %p730_p13, %p729_p12 }
  0x39   : > { %p736_p6 = por %p735_p2, %p734_p1 }
  0x3a   : > { %p732_p0 = pneg %p731_p3 }
  0x3c   : > { %p737_p11 = pnand %p736_p6, %p732_p0 }
  0x3e   : > { %740 = shalt.err (!%p737_p11)
}
  0x3f   : > { %s741_s6 = scalar_lea.vmem %s220_s10, 128  ;;  %s830_s28 = smov [#allocation2]  }
  0x40   : > { %p742_p7 = scmp.ne.s32.totalorder %s220_s10, %s741_s6  ;;  %s746_s7 = sshll.u32 %s830_s28, 4  ;;  %s747_s7 = int_to_ptr.vmem [resolvable:$false] %s746_s7 }
  0x41   : > { %s748_s9 = scalar_lea.vmem %s747_s7, 256  ;;  %p749_p12 = scmp.lt.s32.totalorder %s220_s10, %s747_s7 }
  0x42   : > { %p744_p9 = pnand %p742_p7, %p730_p13  ;;  %p750_p3 = scmp.lt.s32.totalorder %s748_s9, %s741_s6 }
  0x44   : > { %p745_p5 = pneg %p744_p9  ;;  %p751_p4 = por %p750_p3, %p749_p12 }
  0x46   : > { %p752_p8 = pnand %p751_p4, %p745_p5 }
  0x48   : > { %755 = shalt.err (!%p752_p8)
}
  0x49   : > { %617 = dma.hbm_to_vmem [thread:$0]  (!%p960_p10), %s958_s8, 128, %s220_s10, %s209_s12  }
  0x4a   : > { %p1054_p0 = scmp.ne.s32.totalorder %s1049_s26, 0 }
  0x4b   : > { %s981_s13 = sand.u32 (!%p1054_p0), 1, %s816_s19   ;;  %p1055_p4 = scmp.ne.s32.totalorder (!%p1054_p0), %s1047_s24, 0 }
  0x4c   : > { %228 = sbr.rel (%p1054_p0) target bundleno = 813 (0x32d), region = 40  ;;  %s549_s14 = sshll.u32 (!%p1054_p0), %s981_s13, 3 }
  0x4d   : > { %s231_s16 = scalar_lea.sflag (!%p1054_p0), [#allocation3], %s981_s13  ;;  %s234_s17 = scalar_lea.vmem (!%p1054_p0), [#allocation2], %s549_s14 }
  0x51   : > { %799 = dma.done.wait (%p1055_p4), %s231_s16, 128  }
  0x52   : > { %801 = vsyncadd (%p1055_p4), %s231_s16, 4294967168  ;;  %p1056_p8 = scmp.eq.s32.totalorder %s885_s22, 0 }
  0x54   : > { %803 = dma.done.wait (%p1056_p8), [#allocation6], 768   ;;  %p1057_p5 = pmov %p1056_p8 }
  0x55   : > { %v831_v0 = vmov 0.0   ;;  %vm832_vm0 = vmmov 0   ;;  %v666_v1 = vld [vmem:[#allocation5 + $0x8] sm:$0xff]   ;;  %v667_v2 = vld [vmem:[#allocation5] sm:$0xff]   ;;  %v270_v3 = vld [vmem:[%s234_s17] sm:$0xff]  ;;  %vm295_vm1 = vcmask 261120   ;;  %v424_v17 = vlaneseq }
  0x56   : > { %805 = vsyncadd (%p1057_p5), [#allocation6], 4294966528  ;;  %575 = vmatprep.subr.bf16.mxu0 %v831_v0  ;;  %579 = vmatprep.mubr.msk.bf16.mxu0 %vm832_vm0, %v831_v0  ;;  %v668_v4 = vld [vmem:[#allocation7 + $0x18] sm:$0xff]   ;;  %v669_v5 = vld [vmem:[#allocation7 + $0x10] sm:$0xff]   ;;  %v271_v6 = vpack.c.bf16 %v270_v3, %v270_v3  ;;  %vm380_vm2 = vcmask 523264   ;;  %s564_s11 = sshll.u32 %s885_s22, 7 }
  0x57   : > { %583 = vmatprep.subr.bf16.mxu1 %v831_v0  ;;  %591 = vmatprep.mubr.msk.bf16.mxu1 %vm832_vm0, %v831_v0  ;;  %v670_v7 = vld [vmem:[#allocation7 + $0x8] sm:$0xff]   ;;  %v671_v8 = vld [vmem:[#allocation7] sm:$0xff]   ;;  %v425_v18 = vand.u32 127, %v424_v17  ;;  %s268_s12 = scalar_lea.vmem [#allocation8], %s549_s14  ;;  %s450_s28 = scalar_lea.hbm %s1042_s5, %s564_s11 }
  0x58   : > { %576 = vmatpush3.bf16.msra.mxu0 %v666_v1  ;;  %584 = vmatpush3.bf16.msra.mxu1 %v668_v4  ;;  %v553_v9 = vld [vmem:[%s1039_s2] ss:$0 sm:$0xff]  ;;  %s452_s30 = sshll.u32 %s268_s12, 4  ;;  %s439_s7 = scalar_lea.sflag [#allocation4], %s981_s13  ;;  %s453_s30 = int_to_ptr.vmem [resolvable:$true] %s452_s30 }
  0x59   : > { %577 = vmatprep.subr.bf16.mxu0 %v831_v0  ;;  %585 = vmatprep.subr.bf16.mxu1 %v831_v0  ;;  %v557_v19 = vld [vmem:[%s1041_s4] ss:$0 sm:$0xff]  ;;  %vm426_vm3 = vcmp.lt.s32.totalorder %v425_v18, 16  ;;  %s756_s9 = scalar_lea.vmem %s453_s30, 128  ;;  %p1058_p13 = scmp.ne.s32.totalorder %s1052_s23, 0 }
  0x5a   : > { %p757_p10 = scmp.ne.s32.totalorder %s453_s30, %s756_s9  ;;  %s833_s16 = smov [#allocation8]  }
  0x5b   : > { %s760_s17 = sshll.u32 %s833_s16, 4  ;;  %s761_s17 = int_to_ptr.vmem [resolvable:$false] %s760_s17 }
  0x5c   : > { %578 = vmatpush3.bf16.msra.mxu0 %v667_v2  ;;  %586 = vmatpush3.bf16.msra.mxu1 %v669_v5  ;;  %p758_p1 = pnand %p757_p10, %p1058_p13  ;;  %s762_s22 = scalar_lea.vmem %s761_s17, 256 }
  0x5d   : > { %587 = vmatprep.subr.bf16.mxu1 %v831_v0  ;;  %p763_p6 = scmp.lt.s32.totalorder %s453_s30, %s761_s17  ;;  %p764_p11 = scmp.lt.s32.totalorder %s762_s22, %s756_s9 }
  0x5e   : > { %p759_p2 = pneg %p758_p1 }
  0x5f   : > { %580 = vmatmul.mubr.msk.bf16.vlgmr.msra.gmra.mxu0 %vm295_vm1, %v271_v6  ;;  %p765_p7 = por %p764_p11, %p763_p6 }
  0x60   : > { %588 = vmatpush3.bf16.msra.mxu1 %v670_v7 }
  0x61   : > { %589 = vmatprep.subr.bf16.mxu1 %v831_v0  ;;  %p766_p9 = pnand %p765_p7, %p759_p2 }
  0x64   : > { %590 = vmatpush3.bf16.msra.mxu1 %v671_v8 }
 0x11f   : > { %v333_v10 = vpop.f32.mrf.mxu0 }
 0x120   : > { %v334_v11 = vadd.f32 %v553_v9, %v333_v10 }
 0x121   : > { %v581_v12 = vpop.f32.mrf.mxu0 }
 0x122   : > { %v339_v13 = vmax.f32 %v334_v11, 0.0 }
 0x123   : > { %v336_v14 = vpop.f32.mrf.mxu0 }
 0x124   : > { %v340_v15 = vpack.c.bf16 %v339_v13, %v339_v13 }
 0x125   : > { %v582_v16 = vpop.f32.mrf.mxu0 }
 0x126   : > { %592 = vmatmul.mubr.msk.bf16.vlgmr.msra.gmra.mxu1 %vm380_vm2, %v340_v15 }
 0x1e6   : > { %v418_v20 = vpop.f32.mrf.mxu1 }
 0x1e7   : > { %v419_v21 = vadd.f32 %v557_v19, %v418_v20 }
 0x1e8   : > { %v593_v22 = vpop.f32.mrf.mxu1 }
 0x1e9   : > { %v427_v23 = vsel %vm426_vm3, %v419_v21, -1e+30 }
 0x1ea   : > { %428 = vmax.xlane.f32.xlu0 %v427_v23  ;;  %v421_v24 = vpop.f32.mrf.mxu1 }
 0x1ec   : > { %v594_v25 = vpop.f32.mrf.mxu1 }
 0x273   : > { %v429_v26 = vpop.xlane.xlu0 %428 }
 0x274   : > { %v430_v27 = vsub.f32 %v427_v23, %v429_v26 }
 0x276   : > { %v431_v28 = vmul.f32 1.442695, %v430_v27 }
 0x278   : > { %672 = vpow2.f32 %v431_v28 }
 0x285   : > { %v673_v29 = vpop.eup %672 }
 0x286   : > { %433 = vadd.xlane.f32.xlu0 %v673_v29 }
 0x30f   : > { %v434_v30 = vpop.xlane.xlu0 %433 }
 0x310   : > { %674 = vrcp.f32 %v434_v30 }
 0x31d   : > { %v675_v31 = vpop.eup %674 }
 0x31e   : > { %v436_v32 = vmul.f32 %v675_v31, %v673_v29 }
 0x320   : > { %437 = vst [vmem:[%s268_s12] sm:$0xff] %v436_v32 }
 0x321   : > { %769 = shalt.err (!%p766_p9)
}
 0x322   : > { %s770_s14 = scalar_lea.hbm %s450_s28, 128  ;;  %s774_s26 = scalar_lea.hbm %s1042_s5, 384 }
 0x323   : > { %p771_p12 = scmp.ne.s32.totalorder %s450_s28, %s770_s14  ;;  %p775_p4 = scmp.lt.s32.totalorder %s450_s28, %s1042_s5 }
 0x324   : > { %p776_p8 = scmp.lt.s32.totalorder %s774_s26, %s770_s14 }
 0x325   : > { %p772_p3 = pnand %p771_p12, %p1058_p13 }
 0x326   : > { %p777_p5 = por %p776_p8, %p775_p4 }
 0x327   : > { %p773_p0 = pneg %p772_p3 }
 0x329   : > { %p778_p10 = pnand %p777_p5, %p773_p0 }
 0x32b   : > { %781 = shalt.err (!%p778_p10)
}
 0x32c   : > { %605 = dma.vmem_to_hbm [thread:$0]  (%p1058_p13), %s453_s30, 128, %s450_s28, %s439_s7  }
 0x32d PF: > { %p627_p1 = scmp.ge.s32.totalorder %s824_s21, 2  ;;  %s464_s11 = sand.u32 1, %s812_s18  }
 0x32e   : > { %p1059_p2 = scmp.ne.s32.totalorder %s1048_s25, 0  ;;  %s465_s12 = scalar_lea.sflag [#allocation4], %s464_s11 }
 0x330   : > { %p619_p6 = pnand %p627_p1, %p1059_p2 }
 0x332   : > { %p620_p11 = pneg %p619_p6 }
 0x334   : > { %807 = dma.done.wait (%p620_p11), %s465_s12, 128  }
 0x335   : > { %809 = vsyncadd (%p620_p11), %s465_s12, 4294967168  ;;  %p19_p7 = scmp.ge.s32.totalorder %s935_s15, 5   ;;  %s1060_s18 = smov %s816_s19 }
 0x336   : > { %s1061_s19 = smov %s820_s20  ;;  %s1062_s20 = smov %s951_s27 }
 0x337   : > { %s1063_s21 = smov %s935_s15  ;;  %21 = sbr.rel (!%p19_p7) target bundleno = 6 (0x6), region = 93 }
 0x33c   :  { %470 = vsyncpa [#allocation3], 1 }
 0x33d   :  { %472 = vsyncpa [#allocation3 + $0x1], 1 }
 0x33e   :  { %473 = vsyncpa [#allocation6], 1 }
 0x33f   :  { %474 = vsyncpa [#allocation4], 1 }
 0x340   :  { %476 = vsyncpa [#allocation4 + $0x1], 1 }

</bundles_post_ra>
